<compile_context>
chip_gen: v5e
topology: v5e:2x2
jax: 0.10.0
libtpu: 0.0.40
codegen_flags: <defaults>
</compile_context>

<pallas_src>
import jax
import jax.numpy as jnp
from jax.experimental import pallas as pl
from jax.experimental.pallas import tpu as pltpu

LANE = 512                          # lane-dense last dim (multiple of 128)
SUB = 8                             # sublane multiple
MAX_BLOCK_BYTES = 2 * 1024 * 1024   # ~2 MiB per input per pipeline buffer
VMEM_LIMIT_BYTES = 32 * 1024 * 1024


def _round_up(x, m):
    return (x + m - 1) // m * m


def _mask_iou_partial_kernel(p_ref, g_ref, out_ref):
    """Accumulate [sum(sigmoid(p)*g), sum(sigmoid(p)+g)] into (2, 8, LANE)."""
    @pl.when(pl.program_id(0) == 0)
    def _():
        out_ref[...] = jnp.zeros_like(out_ref)

    p = jax.nn.sigmoid(p_ref[...].astype(jnp.float32))
    g = g_ref[...].astype(jnp.float32)

    # Leading-axis (pure VPU) partial reduction into the resident (8, LANE)
    # accumulators; the single cross-lane reduce happens once in the wrapper.
    out_ref[0] += jnp.sum((p * g).reshape(-1, SUB, LANE), axis=0)
    out_ref[1] += jnp.sum((p + g).reshape(-1, SUB, LANE), axis=0)


def mask_iou_loss(pred_mask, ground_truth_mask, pred_iou):
    """pred_mask, ground_truth_mask: [B, 1, H, W]; pred_iou: [B, 1] -> scalar."""
    assert pred_mask.shape == ground_truth_mask.shape, (
        "pred_mask and ground_truth_mask should have the same shape.")

    n = pred_mask.size

    p_flat = pred_mask.reshape(-1)
    g_flat = ground_truth_mask.reshape(-1)
    if not jnp.issubdtype(p_flat.dtype, jnp.floating):
        p_flat = p_flat.astype(jnp.float32)

    # Lane-dense rows, rounded up only to the sublane multiple.
    rows = _round_up(pl.cdiv(n, LANE), SUB)

    # Byte-based block sizing (~MAX_BLOCK_BYTES per input per buffer),
    # balanced across tiles so the padded tail is at most ~num_tiles*SUB rows.
    itemsize = max(p_flat.dtype.itemsize, g_flat.dtype.itemsize)
    max_block_rows = max(SUB, (MAX_BLOCK_BYTES // (LANE * itemsize)) // SUB * SUB)
    num_tiles = pl.cdiv(rows, max_block_rows)
    block_rows = _round_up(pl.cdiv(rows, num_tiles), SUB)
    rows_padded = num_tiles * block_rows
    padded = rows_padded * LANE

    if padded != n:
        # Pad pred with -inf (sigmoid(-inf) == 0.0 exactly) and gt with 0,
        # so no in-kernel masking of the tail is ever needed.
        pad = padded - n
        p_flat = jnp.pad(p_flat, (0, pad), constant_values=-jnp.inf)
        g_flat = jnp.pad(g_flat, (0, pad), constant_values=0)
    p2d = p_flat.reshape(rows_padded, LANE)
    g2d = g_flat.reshape(rows_padded, LANE)

    partials = pl.pallas_call(
        _mask_iou_partial_kernel,
        out_shape=jax.ShapeDtypeStruct((2, SUB, LANE), jnp.float32),
        grid_spec=pltpu.PrefetchScalarGridSpec(
            num_scalar_prefetch=0,
            grid=(num_tiles,),
            in_specs=[
                pl.BlockSpec((block_rows, LANE), lambda i: (i, 0)),  # pred
                pl.BlockSpec((block_rows, LANE), lambda i: (i, 0)),  # gt
            ],
            out_specs=pl.BlockSpec((2, SUB, LANE), lambda i: (0, 0, 0)),
        ),
        compiler_params=pltpu.CompilerParams(
            dimension_semantics=("arbitrary",),
            vmem_limit_bytes=VMEM_LIMIT_BYTES),
        cost_estimate=pl.CostEstimate(
            flops=6 * padded,
            transcendentals=padded,
            bytes_accessed=(p2d.size * p2d.dtype.itemsize
                            + g2d.size * g2d.dtype.itemsize
                            + 2 * SUB * LANE * 4)),
    )(p2d, g2d)

    # Tiny finalize in XLA: one cross-lane reduce, IoU, MSE against pred_iou.
    sums = jnp.sum(partials, axis=(1, 2))
    intersection = sums[0]
    union = sums[1] - intersection            # sum(p) + sum(g) - intersection
    iou = (intersection + 1e-07) / (union + 1e-07)
    diff = iou - pred_iou.astype(jnp.float32)
    return jnp.mean(diff * diff)


def _reference(pred_mask, ground_truth_mask, pred_iou):
    p = jax.nn.sigmoid(pred_mask.astype(jnp.float32))
    g = ground_truth_mask.astype(jnp.float32)
    intersection = jnp.sum(p * g)
    union = jnp.sum(p) + jnp.sum(g) - intersection
    iou = (intersection + 1e-07) / (union + 1e-07)
    return jnp.mean((iou - pred_iou.astype(jnp.float32)) ** 2)


if __name__ == "__main__":
    key = jax.random.PRNGKey(0)
    k1, k2, k3 = jax.random.split(key, 3)

    # Small shape consistent with the module: [B, 1, H, W] masks, [B, 1] iou.
    B, C, H, W = 2, 1, 16, 16
    pred_mask = jax.random.normal(k1, (B, C, H, W), dtype=jnp.float32)
    ground_truth_mask = (jax.random.uniform(k2, (B, C, H, W)) > 0.5).astype(
        jnp.float32)
    pred_iou = jax.random.uniform(k3, (B, 1), dtype=jnp.float32)

    loss = mask_iou_loss(pred_mask, ground_truth_mask, pred_iou)
    jax.block_until_ready(loss)
    ref = _reference(pred_mask, ground_truth_mask, pred_iou)
    assert jnp.allclose(loss, ref, atol=1e-5, rtol=1e-5), (loss, ref)

    # Ragged, multi-tile shape: exercises balanced tiling + -inf tail padding.
    B2, H2, W2 = 3, 1, 600
    pm2 = jax.random.normal(k1, (B2, 1, H2 * 0 + 600, W2), dtype=jnp.float32)
    gt2 = (jax.random.uniform(k2, pm2.shape) > 0.5).astype(jnp.float32)
    iou2 = jax.random.uniform(k3, (B2, 1), dtype=jnp.float32)
    loss2 = mask_iou_loss(pm2, gt2, iou2)
    jax.block_until_ready(loss2)
    ref2 = _reference(pm2, gt2, iou2)
    assert jnp.allclose(loss2, ref2, atol=1e-4, rtol=1e-4), (loss2, ref2)

    # Larger aligned shape: multi-tile accumulation with zero padding.
    B3, H3, W3 = 2, 1024, 1024
    pm3 = jax.random.normal(k1, (B3, 1, H3, W3), dtype=jnp.float32)
    gt3 = (jax.random.uniform(k2, (B3, 1, H3, W3)) > 0.5).astype(jnp.float32)
    iou3 = jax.random.uniform(k3, (B3, 1), dtype=jnp.float32)
    loss3 = mask_iou_loss(pm3, gt3, iou3)
    jax.block_until_ready(loss3)
    ref3 = _reference(pm3, gt3, iou3)
    assert jnp.allclose(loss3, ref3, atol=1e-4, rtol=1e-4), (loss3, ref3)

    print("KERNEL_OK")
</pallas_src>

<mosaic_0001>
module attributes {stable_mosaic.version = 11 : i64} {
  func.func @_mask_iou_partial_kernel(%arg0: i32, %arg1: memref<8x512xf32, #tpu.memory_space<vmem>>, %arg2: memref<8x512xf32, #tpu.memory_space<vmem>>, %arg3: memref<2x8x512xf32, #tpu.memory_space<vmem>>) attributes {dimension_semantics = [#tpu.dimension_semantics<arbitrary>], iteration_bounds = array<i64: 1>, scalar_prefetch = 0 : i64, scratch_operands = 0 : i64, tpu.core_type = #tpu.core_type<tc>, window_params = [{transform_indices = @transform_0, window_bounds = array<i64: 8, 512>}, {transform_indices = @transform_1, window_bounds = array<i64: 8, 512>}, {pipeline_mode = #tpu.pipeline_mode<synchronous>, transform_indices = @transform_2, window_bounds = array<i64: 2, 8, 512>}]} {
    %c0_i32 = arith.constant 0 : i32
    %0 = arith.cmpi eq, %arg0, %c0_i32 : i32
    %1 = arith.extui %0 : i1 to i32
    %c0_i32_0 = arith.constant 0 : i32
    %2 = arith.cmpi ne, %1, %c0_i32_0 : i32
    scf.if %2 {
      %cst_17 = arith.constant 0.000000e+00 : f32
      %28 = vector.broadcast %cst_17 : f32 to vector<2x8x512xf32>
      %c0_18 = arith.constant 0 : index
      %c0_19 = arith.constant 0 : index
      %c0_20 = arith.constant 0 : index
      %29 = vector.load %arg3[%c0_18, %c0_19, %c0_20] : memref<2x8x512xf32, #tpu.memory_space<vmem>>, vector<2x8x512xf32>
      tpu.vector_store %arg3[%c0_18, %c0_19, %c0_20], %28 {strides = array<i32>} : memref<2x8x512xf32, #tpu.memory_space<vmem>>, vector<2x8x512xf32>,
    } else {
    }
    %c0 = arith.constant 0 : index
    %c0_1 = arith.constant 0 : index
    %3 = vector.load %arg1[%c0, %c0_1] : memref<8x512xf32, #tpu.memory_space<vmem>>, vector<8x512xf32>
    %4 = arith.negf %3 : vector<8x512xf32>
    %5 = math.exp %4 : vector<8x512xf32>
    %cst = arith.constant 1.000000e+00 : f32
    %6 = vector.broadcast %cst : f32 to vector<8x512xf32>
    %7 = arith.addf %6, %5 : vector<8x512xf32>
    %8 = arith.divf %6, %7 : vector<8x512xf32>
    %c0_2 = arith.constant 0 : index
    %c0_3 = arith.constant 0 : index
    %9 = vector.load %arg2[%c0_2, %c0_3] : memref<8x512xf32, #tpu.memory_space<vmem>>, vector<8x512xf32>
    %c0_4 = arith.constant 0 : index
    %c0_5 = arith.constant 0 : index
    %c0_6 = arith.constant 0 : index
    %10 = vector.load %arg3[%c0_4, %c0_5, %c0_6] : memref<2x8x512xf32, #tpu.memory_space<vmem>>, vector<1x8x512xf32>
    %11 = vector.shape_cast %10 : vector<1x8x512xf32> to vector<8x512xf32>
    %12 = arith.mulf %8, %9 : vector<8x512xf32>
    %13 = vector.shape_cast %12 : vector<8x512xf32> to vector<1x8x512xf32>
    %cst_7 = arith.constant dense<0.000000e+00> : vector<8x512xf32>
    %14 = vector.multi_reduction <add>, %13, %cst_7 [0] : vector<1x8x512xf32> to vector<8x512xf32>
    %15 = arith.addf %11, %14 : vector<8x512xf32>
    %c0_8 = arith.constant 0 : index
    %c0_9 = arith.constant 0 : index
    %c0_10 = arith.constant 0 : index
    %16 = vector.load %arg3[%c0_8, %c0_9, %c0_10] : memref<2x8x512xf32, #tpu.memory_space<vmem>>, vector<1x8x512xf32>
    %17 = vector.shape_cast %16 : vector<1x8x512xf32> to vector<8x512xf32>
    %18 = vector.shape_cast %15 : vector<8x512xf32> to vector<1x8x512xf32>
    tpu.vector_store %arg3[%c0_8, %c0_9, %c0_10], %18 {strides = array<i32>} : memref<2x8x512xf32, #tpu.memory_space<vmem>>, vector<1x8x512xf32>,
    %c1 = arith.constant 1 : index
    %c0_11 = arith.constant 0 : index
    %c0_12 = arith.constant 0 : index
    %19 = vector.load %arg3[%c1, %c0_11, %c0_12] : memref<2x8x512xf32, #tpu.memory_space<vmem>>, vector<1x8x512xf32>
    %20 = vector.shape_cast %19 : vector<1x8x512xf32> to vector<8x512xf32>
    %21 = arith.addf %8, %9 : vector<8x512xf32>
    %22 = vector.shape_cast %21 : vector<8x512xf32> to vector<1x8x512xf32>
    %cst_13 = arith.constant dense<0.000000e+00> : vector<8x512xf32>
    %23 = vector.multi_reduction <add>, %22, %cst_13 [0] : vector<1x8x512xf32> to vector<8x512xf32>
    %24 = arith.addf %20, %23 : vector<8x512xf32>
    %c1_14 = arith.constant 1 : index
    %c0_15 = arith.constant 0 : index
    %c0_16 = arith.constant 0 : index
    %25 = vector.load %arg3[%c1_14, %c0_15, %c0_16] : memref<2x8x512xf32, #tpu.memory_space<vmem>>, vector<1x8x512xf32>
    %26 = vector.shape_cast %25 : vector<1x8x512xf32> to vector<8x512xf32>
    %27 = vector.shape_cast %24 : vector<8x512xf32> to vector<1x8x512xf32>
    tpu.vector_store %arg3[%c1_14, %c0_15, %c0_16], %27 {strides = array<i32>} : memref<2x8x512xf32, #tpu.memory_space<vmem>>, vector<1x8x512xf32>,
    return
  }
  func.func @transform_0(%arg0: i32) -> (i32, i32) {
    %c0_i32 = arith.constant 0 : i32
    %c0_i32_0 = arith.constant 0 : i32
    return %arg0, %c0_i32 : i32, i32
  }
  func.func @transform_1(%arg0: i32) -> (i32, i32) {
    %c0_i32 = arith.constant 0 : i32
    %c0_i32_0 = arith.constant 0 : i32
    return %arg0, %c0_i32 : i32, i32
  }
  func.func @transform_2(%arg0: i32) -> (i32, i32, i32) {
    %c0_i32 = arith.constant 0 : i32
    %c0_i32_0 = arith.constant 0 : i32
    %c0_i32_1 = arith.constant 0 : i32
    %c0_i32_2 = arith.constant 0 : i32
    return %c0_i32, %c0_i32_0, %c0_i32_1 : i32, i32, i32
  }
}

</mosaic_0001>

<bundles_post_ra>
// kernel: tpu_custom_call.1
= control target key start
LH: loop header
LB: loop body
LE: loop exit
PB: predicated region body
PF: predicated region fallthrough
CT: control target
= control target key end

     0   :  { %7 = vsyncpa [#allocation3], 0  ;;  %s371_s0 = inlined_call_operand.hbm [shape: f32[8,512], index: 0, kind: input, shape index: {}]   ;;  %s372_s1 = inlined_call_operand.hbm [shape: f32[8,512], index: 1, kind: input, shape index: {}]   ;;  %s373_s2 = inlined_call_operand.hbm [shape: f32[2,8,512], index: 2, kind: output, shape index: {}]  }
   0x1   :  { %8 = vsyncpa [#allocation6], 0 }
   0x2   :  { %9 = vsyncpa [#allocation4], 0  ;;  %s15_s11 = sshll.u32 %s371_s0, 4  ;;  %s301_s12 = smov [#allocation2]   ;;  %s16_s11 = int_to_ptr.hbm [resolvable:$true] %s15_s11 }
   0x3   :  { %s17_s13 = sshll.u32 %s301_s12, 4  ;;  %s26_s16 = sshll.u32 %s372_s1, 4  ;;  %s18_s13 = int_to_ptr.vmem [resolvable:$true] %s17_s13  ;;  %s27_s16 = int_to_ptr.hbm [resolvable:$true] %s26_s16 }
   0x4   :  { %20 = dma.hbm_to_vmem [thread:$0]  %s16_s11, 512, %s18_s13, [#allocation3]  }
   0x5   :  { %s302_s17 = smov [#allocation5]  }
   0x6   :  { %s28_s18 = sshll.u32 %s302_s17, 4  ;;  %s29_s18 = int_to_ptr.vmem [resolvable:$true] %s28_s18 }
   0x7   :  { %31 = dma.hbm_to_vmem [thread:$0]  %s27_s16, 512, %s29_s18, [#allocation6]  }
   0x8   :  { %295 = dma.done.wait [#allocation3], 512  }
   0x9   :  { %296 = vsyncadd [#allocation3], 4294966784 }
   0xa   :  { %297 = dma.done.wait [#allocation6], 512  }
   0xb   :  { %298 = vsyncadd [#allocation6], 4294966784  ;;  %v52_v0 = vld [vmem:[#allocation2] sm:$0xff]  ;;  %v53_v1 = vld [vmem:[#allocation2 + $0x8] sm:$0xff]  ;;  %s303_s0 = smov [#allocation7]   ;;  %s183_s21 = sshll.u32 %s373_s2, 4  ;;  %s184_s21 = int_to_ptr.hbm [resolvable:$true] %s183_s21 }
   0xc   :  { %v197_v2 = vmul.f32 -1.442695, %v52_v0  ;;  %v198_v3 = vmul.f32 -1.442695, %v53_v1  ;;  %v54_v4 = vld [vmem:[#allocation2 + $0x10] sm:$0xff]  ;;  %v55_v6 = vld [vmem:[#allocation2 + $0x18] sm:$0xff] }
   0xd   :  { %v199_v5 = vmul.f32 -1.442695, %v54_v4  ;;  %v200_v7 = vmul.f32 -1.442695, %v55_v6  ;;  %v132_v43 = vld [vmem:[#allocation5] sm:$0xff]  ;;  %v133_v48 = vld [vmem:[#allocation5 + $0x8] sm:$0xff] }
   0xe   :  { %207 = vpow2.f32 %v197_v2  ;;  %v134_v62 = vld [vmem:[#allocation5 + $0x10] sm:$0xff]  ;;  %v135_v2 = vld [vmem:[#allocation5 + $0x18] sm:$0xff]  ;;  %s181_s1 = sshll.u32 %s303_s0, 4  ;;  %s304_s22 = smov 512   ;;  %s182_s1 = int_to_ptr.vmem [resolvable:$true] %s181_s1 }
   0xf   :  { %209 = vpow2.f32 %v198_v3  ;;  %s305_s23 = smov 32  }
  0x10   :  { %211 = vpow2.f32 %v199_v5 }
  0x11   :  { %213 = vpow2.f32 %v200_v7 }
  0x14   :  { %v208_v8 = vpop.eup %207 }
  0x15   :  { %v210_v9 = vpop.eup %209  ;;  %v68_v10 = vadd.f32 1.0, %v208_v8 }
  0x16   :  { %v212_v11 = vpop.eup %211  ;;  %v69_v12 = vadd.f32 1.0, %v210_v9 }
  0x17   :  { %v214_v13 = vpop.eup %213  ;;  %215 = vrcp.f32 %v68_v10  ;;  %v70_v14 = vadd.f32 1.0, %v212_v11  ;;  %v81_v16 = vand.u32 2147483647, %v68_v10  ;;  %v83_v17 = vand.u32 2147483648, %v68_v10 }
  0x18   :  { %217 = vrcp.f32 %v69_v12  ;;  %v71_v15 = vadd.f32 1.0, %v214_v13  ;;  %v96_v19 = vand.u32 2147483647, %v69_v12  ;;  %v98_v20 = vand.u32 2147483648, %v69_v12 }
  0x19   :  { %219 = vrcp.f32 %v70_v14  ;;  %vm77_vm0 = vweird.f32 %v68_v10  ;;  %vm92_vm1 = vweird.f32 %v69_v12  ;;  %vm327_vm3 = vcmp.eq.f32.partialorder %v81_v16, 8.507059e+37 }
  0x1a   :  { %221 = vrcp.f32 %v71_v15  ;;  %v84_v26 = vor.u32 1.1754944e-38, %v83_v17  ;;  %vm331_vm5 = vcmp.eq.f32.partialorder %v96_v19, 8.507059e+37  ;;  %v99_v30 = vor.u32 1.1754944e-38, %v98_v20 }
  0x1b   :  { %v111_v34 = vand.u32 2147483647, %v70_v14  ;;  %v113_v35 = vand.u32 2147483648, %v70_v14  ;;  %vm107_vm7 = vweird.f32 %v70_v14  ;;  %v128_v39 = vand.u32 2147483648, %v71_v15 }
  0x1c   :  { %vm122_vm10 = vweird.f32 %v71_v15  ;;  %v126_v46 = vand.u32 2147483647, %v71_v15 }
  0x1d   :  { %v216_v18 = vpop.eup %215  ;;  %vm347_vm12 = vcmp.eq.f32.partialorder %v111_v34, 8.507059e+37  ;;  %v114_v51 = vor.u32 1.1754944e-38, %v113_v35  ;;  %v129_v56 = vor.u32 1.1754944e-38, %v128_v39 }
  0x1e   :  { %v218_v21 = vpop.eup %217  ;;  %v73_v22 = vmul.f32 %v216_v18, %v68_v10  ;;  %vm78_vm2 = vweird.f32 %v216_v18  ;;  %vm127_vm15 = vcmp.eq.f32.partialorder %v126_v46, 8.507059e+37 }
  0x1f   :  { %v88_v23 = vmul.f32 %v218_v21, %v69_v12  ;;  %v220_v27 = vpop.eup %219  ;;  %vm93_vm4 = vweird.f32 %v218_v21  ;;  %vm336_vm6 = vmor %vm77_vm0, %vm78_vm2 }
  0x20   :  { %v74_v24 = vsub.f32 1.0, %v73_v22  ;;  %v222_v31 = vpop.eup %221  ;;  %v103_v33 = vmul.f32 %v220_v27, %v70_v14  ;;  %vm341_vm8 = vmor %vm92_vm1, %vm93_vm4  ;;  %vm108_vm9 = vweird.f32 %v220_v27 }
  0x21   :  { %v89_v28 = vsub.f32 1.0, %v88_v23  ;;  %v118_v38 = vmul.f32 %v222_v31, %v71_v15  ;;  %vm123_vm11 = vweird.f32 %v222_v31  ;;  %vm356_vm13 = vmor %vm107_vm7, %vm108_vm9 }
  0x22   :  { %v75_v32 = vmul.f32 %v216_v18, %v74_v24  ;;  %v104_v42 = vsub.f32 1.0, %v103_v33  ;;  %vm124_vm14 = vmor %vm122_vm10, %vm123_vm11 }
  0x23   :  { %v90_v37 = vmul.f32 %v218_v21, %v89_v28  ;;  %v119_v45 = vsub.f32 1.0, %v118_v38 }
  0x24   :  { %v76_v40 = vadd.f32 %v216_v18, %v75_v32  ;;  %v105_v49 = vmul.f32 %v220_v27, %v104_v42 }
  0x25   :  { %v91_v44 = vadd.f32 %v218_v21, %v90_v37  ;;  %v120_v55 = vmul.f32 %v222_v31, %v119_v45 }
  0x26   :  { %v80_v47 = vsel %vm336_vm6, %v216_v18, %v76_v40  ;;  %v106_v59 = vadd.f32 %v220_v27, %v105_v49 }
  0x27   :  { %v85_v52 = vsel %vm327_vm3, %v84_v26, %v80_v47  ;;  %v95_v53 = vsel %vm341_vm8, %v218_v21, %v91_v44  ;;  %v121_v63 = vadd.f32 %v222_v31, %v120_v55 }
  0x28   :  { %v140_v57 = vmul.f32 %v132_v43, %v85_v52  ;;  %v100_v58 = vsel %vm331_vm5, %v99_v30, %v95_v53  ;;  %v161_v60 = vadd.f32 %v132_v43, %v85_v52  ;;  %v110_v1 = vsel %vm356_vm13, %v220_v27, %v106_v59 }
  0x29   :  { %v141_v61 = vmul.f32 %v133_v48, %v100_v58  ;;  %v162_v0 = vadd.f32 %v133_v48, %v100_v58  ;;  %v115_v3 = vsel %vm347_vm12, %v114_v51, %v110_v1  ;;  %v125_v4 = vsel %vm124_vm14, %v222_v31, %v121_v63 }
  0x2a   :  { %152 = vst [vmem:[#allocation7] sm:$0xff] %v140_v57  ;;  %v142_v5 = vmul.f32 %v134_v62, %v115_v3  ;;  %v130_v6 = vsel %vm127_vm15, %v129_v56, %v125_v4  ;;  %v163_v7 = vadd.f32 %v134_v62, %v115_v3 }
  0x2b   :  { %153 = vst [vmem:[#allocation7 + $0x8] sm:$0xff] %v141_v61  ;;  %v143_v8 = vmul.f32 %v135_v2, %v130_v6  ;;  %v164_v9 = vadd.f32 %v135_v2, %v130_v6 }
  0x2c   :  { %173 = vst [vmem:[#allocation7 + $0x20] sm:$0xff] %v161_v60 }
  0x2d   :  { %174 = vst [vmem:[#allocation7 + $0x28] sm:$0xff] %v162_v0 }
  0x2e   :  { %154 = vst [vmem:[#allocation7 + $0x10] sm:$0xff] %v142_v5 }
  0x2f   :  { %155 = vst [vmem:[#allocation7 + $0x18] sm:$0xff] %v143_v8 }
  0x30   :  { %175 = vst [vmem:[#allocation7 + $0x30] sm:$0xff] %v163_v7 }
  0x31   :  { %176 = vst [vmem:[#allocation7 + $0x38] sm:$0xff] %v164_v9 }
  0x32   :  { %189 = dma.vmem_to_hbm [thread:$0]  %s182_s1, 1024, %s184_s21, [#allocation4], %s304_s22, %s304_s22, %s305_s23  }
  0x33   :  { %299 = dma.done.wait [#allocation4], 1024  }
  0x34   :  { %300 = vsyncadd [#allocation4], 4294966272 }
  0x35   :  { %194 = vsyncpa [#allocation3], 1 }
  0x36   :  { %195 = vsyncpa [#allocation6], 1 }
  0x37   :  { %196 = vsyncpa [#allocation4], 1 }

</bundles_post_ra>
